<compile_context>
chip_gen: v6e
topology: v6e:2x2x1
jax: 0.10.0
libtpu: 0.0.40
codegen_flags: <defaults>
</compile_context>

<pallas_src>
import functools

import jax
import jax.numpy as jnp
from jax.experimental import pallas as pl
from jax.experimental.pallas import tpu as pltpu

_VAR_EPS = 1e-8  # matches torch.sqrt(torch.var(x, -1) + 1e-08)


# ---------------------------------------------------------------------------
# Pallas kernel: per (batch-tile, D-tile) block compute mean & unbiased std
# over the time (lane) axis.
# ---------------------------------------------------------------------------
def _tstp_kernel(x_ref, o_ref, *, T):
    # x_ref block: (Bt, Dt, T) -- native layout, time on the lane axis.
    x = x_ref[...].astype(jnp.float32)                        # (Bt, Dt, T)

    # Two-pass unbiased variance in f32 (stable; torch.var default is ddof=1).
    mean = jnp.sum(x, axis=-1, keepdims=True) * (1.0 / T)     # (Bt, Dt, 1)
    diff = x - mean
    var = jnp.sum(diff * diff, axis=-1, keepdims=True) * (1.0 / (T - 1))
    std = jnp.sqrt(var + _VAR_EPS)                            # (Bt, Dt, 1)

    # o_ref block: (Bt, 2, Dt) -- two lane-dense row stores, no transpose.
    o_ref[:, 0, :] = jnp.squeeze(mean, -1).astype(o_ref.dtype)
    o_ref[:, 1, :] = jnp.squeeze(std, -1).astype(o_ref.dtype)


# ---------------------------------------------------------------------------
# Tiling helpers
# ---------------------------------------------------------------------------
def _pick_d_tile(D, cap):
    """Feature-axis tile: whole D when it fits, otherwise a 128-multiple
    divisor (keeps the output lane-dense and the input (8,128)-legal)."""
    if D <= cap:
        return D
    divs128 = [t for t in range(128, D + 1, 128) if D % t == 0]
    if divs128:
        under = [t for t in divs128 if t <= cap]
        return max(under) if under else min(divs128)
    # TODO(synk): pathological D with no 128-multiple divisor falls back to a
    # single whole-D block; pad-and-mask tiling would bound VMEM there too.
    return D


def _choose_tiles(B, D, T, itemsize, budget_bytes):
    """Pick (Bt, d_tile) so double-buffered input + ~2 live f32 temporaries
    per element stay within the VMEM byte budget."""
    per_elem = 2 * itemsize + 2 * 4          # 2x input buffers + ~2 f32 temps
    max_elems = max(budget_bytes // per_elem, 8 * max(T, 1))
    d_tile = _pick_d_tile(D, max(max_elems // max(T, 1), 8))
    bt = 1
    for cand in range(min(B, 8), 0, -1):     # fold batch rows, cap at 8
        if B % cand == 0 and cand * d_tile * T <= max_elems:
            bt = cand
            break
    return bt, d_tile


# ---------------------------------------------------------------------------
# Wrapper
# ---------------------------------------------------------------------------
def tstp(x, *, vmem_budget_bytes=12 * 1024 * 1024):
    """Temporal statistics pooling.

    x: (B, ..., T) e.g. (B, C, F, T) from a ResNet front-end.
    Returns (B, 2*D), D = prod of the middle dims; first D columns are the
    temporal mean, last D the unbiased std (+1e-8), like the PyTorch TSTP.
    """
    B = x.shape[0]
    T = x.shape[-1]
    assert T >= 2, "TSTP needs at least 2 time frames for unbiased variance"
    D = 1
    for s in x.shape[1:-1]:
        D *= s

    # Free view, no HBM transpose: kernel works on the native (B, D, T) layout.
    xv = x.reshape(B, D, T)

    bt, d_tile = _choose_tiles(B, D, T, jnp.dtype(x.dtype).itemsize,
                               vmem_budget_bytes)

    # Guarantee >= 2 grid steps when possible so both v7x TensorCores get work.
    if (B // bt) * (D // d_tile) == 1:
        if bt % 2 == 0:
            bt //= 2
        elif d_tile % 256 == 0:
            d_tile //= 2

    grid = (B // bt, D // d_tile)

    out = pl.pallas_call(
        functools.partial(_tstp_kernel, T=T),
        out_shape=jax.ShapeDtypeStruct((B, 2, D), jnp.float32),
        grid=grid,
        in_specs=[pl.BlockSpec((bt, d_tile, T), lambda b, d: (b, d, 0))],
        out_specs=pl.BlockSpec((bt, 2, d_tile), lambda b, d: (b, 0, d)),
        compiler_params=pltpu.CompilerParams(
            dimension_semantics=("parallel", "parallel"),
            vmem_limit_bytes=32 * 1024 * 1024),
    )(xv)

    # Row-major (B, 2, D) -> (B, 2*D) == cat((mean_flat, std_flat), dim=1).
    return out.reshape(B, 2 * D)


# ---------------------------------------------------------------------------
if __name__ == "__main__":
    key = jax.random.PRNGKey(0)
    B, C, F, T = 2, 4, 16, 16
    x = jax.random.normal(key, (B, C, F, T), jnp.float32)

    out = tstp(x)
    out = jax.block_until_ready(out)
    assert out.shape == (B, 2 * C * F), out.shape

    # Pure-JAX reference (torch semantics: unbiased variance + 1e-8).
    mean_ref = jnp.mean(x, axis=-1).reshape(B, -1)
    std_ref = jnp.sqrt(jnp.var(x, axis=-1, ddof=1) + 1e-8).reshape(B, -1)
    ref = jnp.concatenate([mean_ref, std_ref], axis=1)

    assert bool(jnp.all(jnp.isfinite(out)))
    assert jnp.allclose(out, ref, atol=1e-5, rtol=1e-5), float(
        jnp.max(jnp.abs(out - ref)))
    print("KERNEL_OK")
</pallas_src>

<mosaic_0001>
module attributes {stable_mosaic.version = 11 : i64} {
  func.func @_tstp_kernel(%arg0: i32, %arg1: i32, %arg2: memref<1x64x16xf32, #tpu.memory_space<vmem>>, %arg3: memref<1x2x64xf32, #tpu.memory_space<vmem>>) attributes {dimension_semantics = [#tpu.dimension_semantics<parallel>, #tpu.dimension_semantics<parallel>], iteration_bounds = array<i64: 2, 1>, scalar_prefetch = 0 : i64, scratch_operands = 0 : i64, tpu.core_type = #tpu.core_type<tc>, window_params = [{transform_indices = @transform_0, window_bounds = array<i64: 1, 64, 16>}, {transform_indices = @transform_1, window_bounds = array<i64: 1, 2, 64>}]} {
    %c0 = arith.constant 0 : index
    %c0_0 = arith.constant 0 : index
    %c0_1 = arith.constant 0 : index
    %0 = vector.load %arg2[%c0, %c0_0, %c0_1] : memref<1x64x16xf32, #tpu.memory_space<vmem>>, vector<1x64x16xf32>
    %cst = arith.constant dense<0.000000e+00> : vector<1x64xf32>
    %1 = vector.multi_reduction <add>, %0, %cst [2] : vector<1x64x16xf32> to vector<1x64xf32>
    %2 = vector.shape_cast %1 : vector<1x64xf32> to vector<1x64x1xf32>
    %cst_2 = arith.constant 6.250000e-02 : f32
    %3 = vector.broadcast %cst_2 : f32 to vector<1x64x1xf32>
    %4 = arith.mulf %2, %3 : vector<1x64x1xf32>
    %5 = vector.broadcast %4 : vector<1x64x1xf32> to vector<1x64x16xf32>
    %6 = arith.subf %0, %5 : vector<1x64x16xf32>
    %7 = arith.mulf %6, %6 : vector<1x64x16xf32>
    %cst_3 = arith.constant dense<0.000000e+00> : vector<1x64xf32>
    %8 = vector.multi_reduction <add>, %7, %cst_3 [2] : vector<1x64x16xf32> to vector<1x64xf32>
    %9 = vector.shape_cast %8 : vector<1x64xf32> to vector<1x64x1xf32>
    %cst_4 = arith.constant 0.0666666701 : f32
    %10 = vector.broadcast %cst_4 : f32 to vector<1x64x1xf32>
    %11 = arith.mulf %9, %10 : vector<1x64x1xf32>
    %cst_5 = arith.constant 9.99999993E-9 : f32
    %12 = vector.broadcast %cst_5 : f32 to vector<1x64x1xf32>
    %13 = arith.addf %11, %12 : vector<1x64x1xf32>
    %14 = math.sqrt %13 : vector<1x64x1xf32>
    %15 = vector.shape_cast %4 : vector<1x64x1xf32> to vector<1x64xf32>
    %c0_6 = arith.constant 0 : index
    %c0_7 = arith.constant 0 : index
    %c0_8 = arith.constant 0 : index
    %16 = vector.load %arg3[%c0_6, %c0_7, %c0_8] : memref<1x2x64xf32, #tpu.memory_space<vmem>>, vector<1x1x64xf32>
    %17 = vector.shape_cast %16 : vector<1x1x64xf32> to vector<1x64xf32>
    %18 = vector.shape_cast %15 : vector<1x64xf32> to vector<1x1x64xf32>
    tpu.vector_store %arg3[%c0_6, %c0_7, %c0_8], %18 {strides = array<i32>} : memref<1x2x64xf32, #tpu.memory_space<vmem>>, vector<1x1x64xf32>,
    %19 = vector.shape_cast %14 : vector<1x64x1xf32> to vector<1x64xf32>
    %c0_9 = arith.constant 0 : index
    %c1 = arith.constant 1 : index
    %c0_10 = arith.constant 0 : index
    %20 = vector.load %arg3[%c0_9, %c1, %c0_10] : memref<1x2x64xf32, #tpu.memory_space<vmem>>, vector<1x1x64xf32>
    %21 = vector.shape_cast %20 : vector<1x1x64xf32> to vector<1x64xf32>
    %22 = vector.shape_cast %19 : vector<1x64xf32> to vector<1x1x64xf32>
    tpu.vector_store %arg3[%c0_9, %c1, %c0_10], %22 {strides = array<i32>} : memref<1x2x64xf32, #tpu.memory_space<vmem>>, vector<1x1x64xf32>,
    return
  }
  func.func @transform_0(%arg0: i32, %arg1: i32) -> (i32, i32, i32) {
    %c0_i32 = arith.constant 0 : i32
    %c0_i32_0 = arith.constant 0 : i32
    return %arg0, %arg1, %c0_i32 : i32, i32, i32
  }
  func.func @transform_1(%arg0: i32, %arg1: i32) -> (i32, i32, i32) {
    %c0_i32 = arith.constant 0 : i32
    %c0_i32_0 = arith.constant 0 : i32
    return %arg0, %c0_i32, %arg1 : i32, i32, i32
  }
}

</mosaic_0001>

<bundles_post_ra>
// kernel: tpu_custom_call.1
= control target key start
LH: loop header
LB: loop body
LE: loop exit
PB: predicated region body
PF: predicated region fallthrough
CT: control target
= control target key end

     0   :  { %6 = vsyncpa [#allocation3], 0  ;;  %s893_s0 = inlined_call_operand.vmem [shape: f32[2,64,16], index: 0, kind: input, shape index: {}]   ;;  %s894_s1 = inlined_call_operand.hbm [shape: f32[2,2,64], index: 1, kind: output, shape index: {}]  }
   0x1   :  { %8 = vsyncpa [#allocation3 + $0x1], 0  ;;  %s675_s6 = smov 0   ;;  %s677_s7 = smov 0  }
   0x2   :  { %s679_s8 = smov 0   ;;  %s681_s9 = smov 0  }
   0x3   :  { %s683_s10 = smov 0   ;;  %s685_s11 = smov 0  }
   0x4 LB: > { %s502_s12 = sadd.s32 4294967295, %s662_s11   ;;  %s503_s13 = sadd.s32 4294967294, %s662_s11   ;;  %s662_s11 = sphi %s685_s11, %s14_s11   ;;  %s658_s10 = sphi %s683_s10, %s901_s10   ;;  %s654_s9 = sphi %s681_s9, %s900_s9   ;;  %s650_s8 = sphi %s679_s8, %s899_s8   ;;  %s646_s7 = sphi %s677_s7, %s898_s7   ;;  %s642_s6 = sphi %s675_s6, %s897_s6  }
   0x5   : > { %s26_s14 = sadd.s32 1, %s658_s10  ;;  %s63_s15 = sadd.s32 1, %s650_s8 }
   0x6   : > { %p28_p0 = scmp.ge.s32.totalorder %s26_s14, 2  ;;  %p73_p1 = scmp.ne.s32.totalorder %s650_s8, %s646_s7 }
   0x7   : > { %p74_p2 = scmp.eq.s32.totalorder %s502_s12, 1  ;;  %p79_p3 = scmp.ne.s32.totalorder %s646_s7, %s642_s6 }
   0x8   : > { %s903_s14 = smov (%p28_p0, %s26_s14), 0  ;;  %p80_p5 = scmp.eq.s32.totalorder %s503_s13, 1 }
   0x9   : > { %p715_p4 = por %p74_p2, %p73_p1  ;;  %s58_s17 = ssub.s32 %s658_s10, %s903_s14 }
   0xa   : > { %p506_p6 = scmp.ge.s32.totalorder %s662_s11, 1  ;;  %p61_p7 = scmp.eq.s32.totalorder %s58_s17, 0 }
   0xb   : > { %p722_p8 = por %p80_p5, %p79_p3  ;;  %p111_p9 = scmp.lt.s32.totalorder %s662_s11, 3 }
   0xc   : > { %s728_s19 = scalar_select %p61_p7, %s650_s8, %s63_s15  }
   0xd   : > { %p112_p10 = pnand %p506_p6, %p111_p9 }
   0xe   : > { %p136_p11 = scmp.lt.s32.totalorder (!%p112_p10), %s654_s9, 1  ;;  %s132_s25 = sand.u32 (!%p112_p10), 1, %s646_s7  }
   0xf   : > { %115 = sbr.rel (%p112_p10) target bundleno = 364 (0x16c), region = 24  ;;  %s507_s26 = sshll.u32 (!%p112_p10), %s132_s25, 1 }
  0x10   : > { %s800_s27 = scalar_lea.vmem (!%p112_p10), [#allocation2], %s507_s26  ;;  %s511_s28 = sshll.u32 (!%p112_p10), %s654_s9, 5 }
  0x11   : > { %s428_s29 = sshll.u32 (!%p112_p10), %s800_s27, 4  ;;  %s848_s3 = scalar_lea.hbm (!%p112_p10), %s894_s1, %s511_s28  ;;  %s429_s29 = int_to_ptr.vmem [resolvable:$true] %s428_s29 }
  0x12   : > { %s414_s4 = scalar_lea.sflag (!%p112_p10), [#allocation3], %s132_s25  ;;  %s586_s5 = scalar_lea.vmem (!%p112_p10), %s429_s29, 32 }
  0x13   : > { %p587_p12 = scmp.ne.s32.totalorder (!%p112_p10), %s429_s29, %s586_s5 }
  0x14   : > { %s137_s20 = scalar_select %p136_p11, %s654_s9, 1  ;;  %vm153_vm0 = vcmask 130048   ;;  %v306_v16 = vlaneseq  ;;  %vm317_vm1 = vcmask 130112   ;;  %vm324_vm2 = vcmask 195712  }
  0x15   : > { %vm331_vm3 = vcmask 261312   ;;  %vm338_vm4 = vcmask 326912   ;;  %vm345_vm5 = vcmask 392512   ;;  %vm352_vm6 = vcmask 458112   ;;  %p588_p13 = pnand %p587_p12, %p715_p4  ;;  %s664_s9 = smov [#allocation2]  }
  0x16   : > { %s514_s21 = sshll.u32 %s137_s20, 6  ;;  %v307_v17 = vand.u32 127, %v306_v16  ;;  %v309_v18 = vshrl.u32 %v306_v16, 7  ;;  %vm359_vm7 = vcmask 523712   ;;  %vm362_vm8 = vcmask 516096   ;;  %s590_s12 = sshll.u32 %s664_s9, 4  ;;  %s591_s12 = int_to_ptr.vmem [resolvable:$false] %s590_s12 }
  0x17   : > { %s143_s24 = scalar_lea.vmem %s893_s0, %s514_s21  ;;  %p589_p0 = pneg %p588_p13 }
  0x18   : > { %v145_v0 = vld [vmem:[%s143_s24] sm:$0xff]  ;;  %v147_v1 = vld [vmem:[%s143_s24 + $0x10] sm:$0xff]  ;;  %v146_v2 = vld [vmem:[%s143_s24 + $0x8] sm:$0xff]  ;;  %v319_v19 = vadd.s32 4294967280, %v307_v17  ;;  %v312_v20 = vadd.s32 4294967288, %v307_v17  ;;  %v326_v21 = vadd.s32 4294967272, %v307_v17  ;;  %v755_v27 = vsub.s32 %v307_v17, %v309_v18  ;;  %p593_p1 = scmp.lt.s32.totalorder %s429_s29, %s591_s12 }
  0x19   : > { %v154_v3 = vsel %vm153_vm0, %v145_v0, 0.0  ;;  %v160_v4 = vsel %vm153_vm0, %v147_v1, 0.0  ;;  %v148_v5 = vld [vmem:[%s143_s24 + $0x18] sm:$0xff]  ;;  %v157_v6 = vsel %vm153_vm0, %v146_v2, 0.0  ;;  %v739_v8 = vld [vmem:[%s143_s24 + $0x20] sm:$0xff]  ;;  %v741_v9 = vld [vmem:[%s143_s24 + $0x28] sm:$0xff] }
  0x1a   : > { %155 = vadd.xlane.f32.xlu0 %v154_v3  ;;  %161 = vadd.xlane.f32.xlu1 %v160_v4  ;;  %v163_v7 = vsel %vm153_vm0, %v148_v5, 0.0  ;;  %v166_v10 = vsel %vm153_vm0, %v739_v8, 0.0  ;;  %v169_v11 = vsel %vm153_vm0, %v741_v9, 0.0  ;;  %v747_v12 = vld [vmem:[%s143_s24 + $0x30] sm:$0xff]  ;;  %v749_v13 = vld [vmem:[%s143_s24 + $0x38] sm:$0xff]  ;;  %v333_v26 = vadd.s32 4294967264, %v307_v17 }
  0x1b   : > { %v172_v14 = vsel %vm153_vm0, %v747_v12, 0.0  ;;  %v175_v15 = vsel %vm153_vm0, %v749_v13, 0.0  ;;  %v757_v28 = vsub.s32 %v319_v19, %v309_v18  ;;  %v759_v31 = vsub.s32 %v312_v20, %v309_v18  ;;  %s592_s13 = scalar_lea.vmem %s591_s12, 64 }
  0x1c   : > { %v761_v32 = vsub.s32 %v326_v21, %v309_v18  ;;  %v340_v35 = vadd.s32 4294967256, %v307_v17  ;;  %v347_v36 = vadd.s32 4294967248, %v307_v17  ;;  %v763_v40 = vsub.s32 %v333_v26, %v309_v18  ;;  %p594_p2 = scmp.lt.s32.totalorder %s592_s13, %s586_s5 }
  0x1d   : > { %v354_v44 = vadd.s32 4294967240, %v307_v17 }
  0x1e   : > { %158 = vadd.xlane.f32.xlu0 %v157_v6  ;;  %164 = vadd.xlane.f32.xlu1 %v163_v7  ;;  %v770_v51 = vsub.s32 %v340_v35, %v309_v18  ;;  %v772_v53 = vsub.s32 %v347_v36, %v309_v18  ;;  %p595_p3 = por %p594_p2, %p593_p1 }
  0x1f   : > { %v777_v60 = vsub.s32 %v354_v44, %v309_v18 }
  0x20   : > { %p596_p5 = pnand %p595_p3, %p589_p0 }
  0x22   : > { %167 = vadd.xlane.f32.xlu0 %v166_v10  ;;  %170 = vadd.xlane.f32.xlu1 %v169_v11 }
  0x26   : > { %173 = vadd.xlane.f32.xlu0 %v172_v14  ;;  %176 = vadd.xlane.f32.xlu1 %v175_v15 }
  0xa3   : > { %v156_v22 = vpop.xlane.xlu0 %155  ;;  %v162_v23 = vpop.xlane.xlu1 %161 }
  0xa4   : > { %v178_v24 = vmul.f32 0.0625, %v156_v22  ;;  %v180_v25 = vmul.f32 0.0625, %v162_v23 }
  0xa6   : > { %v186_v29 = vsub.f32 %v145_v0, %v178_v24  ;;  %v188_v30 = vsub.f32 %v147_v1, %v180_v25  ;;  %v311_v41 = vrot.slane %v178_v24, %v755_v27  ;;  %v323_v42 = vrot.slane %v180_v25, %v757_v28 }
  0xa7   : > { %v159_v33 = vpop.xlane.xlu0 %158  ;;  %v165_v34 = vpop.xlane.xlu1 %164 }
  0xa8   : > { %v179_v37 = vmul.f32 0.0625, %v159_v33  ;;  %v181_v38 = vmul.f32 0.0625, %v165_v34  ;;  %v194_v39 = vmul.f32 %v186_v29, %v186_v29  ;;  %v196_v43 = vmul.f32 %v188_v30, %v188_v30 }
  0xaa   : > { %v187_v45 = vsub.f32 %v146_v2, %v179_v37  ;;  %v316_v46 = vrot.slane %v179_v37, %v759_v31  ;;  %v189_v47 = vsub.f32 %v148_v5, %v181_v38  ;;  %v330_v48 = vrot.slane %v181_v38, %v761_v32 }
  0xab   : > { %v202_v49 = vsel %vm153_vm0, %v194_v39, 0.0  ;;  %v168_v50 = vpop.xlane.xlu0 %167  ;;  %v171_v52 = vpop.xlane.xlu1 %170  ;;  %v208_v59 = vsel %vm153_vm0, %v196_v43, 0.0 }
  0xac   : > { %v318_v54 = vsel %vm317_vm1, %v316_v46, %v311_v41  ;;  %203 = vadd.xlane.f32.xlu0 %v202_v49  ;;  %v182_v55 = vmul.f32 0.0625, %v168_v50  ;;  %v183_v56 = vmul.f32 0.0625, %v171_v52  ;;  %v195_v57 = vmul.f32 %v187_v45, %v187_v45 }
  0xad   : > { %v325_v58 = vsel %vm324_vm2, %v323_v42, %v318_v54  ;;  %v197_v61 = vmul.f32 %v189_v47, %v189_v47 }
  0xae   : > { %v332_v62 = vsel %vm331_vm3, %v330_v48, %v325_v58  ;;  %v190_v63 = vsub.f32 %v739_v8, %v182_v55  ;;  %v337_v0 = vrot.slane %v182_v55, %v763_v40  ;;  %v191_v1 = vsub.f32 %v741_v9, %v183_v56 }
  0xaf   : > { %v344_v2 = vrot.slane %v183_v56, %v770_v51  ;;  %v205_v3 = vsel %vm153_vm0, %v195_v57, 0.0  ;;  %v174_v4 = vpop.xlane.xlu0 %173  ;;  %v177_v5 = vpop.xlane.xlu1 %176  ;;  %v211_v8 = vsel %vm153_vm0, %v197_v61, 0.0 }
  0xb0   : > { %v339_v6 = vsel %vm338_vm4, %v337_v0, %v332_v62  ;;  %209 = vadd.xlane.f32.xlu0 %v208_v59  ;;  %206 = vadd.xlane.f32.xlu1 %v205_v3  ;;  %v184_v7 = vmul.f32 0.0625, %v174_v4  ;;  %v185_v10 = vmul.f32 0.0625, %v177_v5  ;;  %v198_v11 = vmul.f32 %v190_v63, %v190_v63 }
  0xb1   : > { %v199_v9 = vmul.f32 %v191_v1, %v191_v1  ;;  %v346_v18 = vsel %vm345_vm5, %v344_v2, %v339_v6 }
  0xb2   : > { %v192_v14 = vsub.f32 %v747_v12, %v184_v7  ;;  %v351_v15 = vrot.slane %v184_v7, %v772_v53  ;;  %v193_v16 = vsub.f32 %v749_v13, %v185_v10  ;;  %v358_v17 = vrot.slane %v185_v10, %v777_v60 }
  0xb3   : > { %v214_v19 = vsel %vm153_vm0, %v198_v11, 0.0  ;;  %v217_v12 = vsel %vm153_vm0, %v199_v9, 0.0 }
  0xb4   : > { %v353_v20 = vsel %vm352_vm6, %v351_v15, %v346_v18  ;;  %212 = vadd.xlane.f32.xlu1 %v211_v8  ;;  %215 = vadd.xlane.f32.xlu0 %v214_v19  ;;  %v200_v21 = vmul.f32 %v192_v14, %v192_v14  ;;  %v201_v23 = vmul.f32 %v193_v16, %v193_v16 }
  0xb5   : > { %v360_v22 = vsel %vm359_vm7, %v358_v17, %v353_v20 }
  0xb6   : > { %v220_v24 = vsel %vm153_vm0, %v200_v21, 0.0  ;;  %363 = vst.msk [vmem:[%s800_s27] sm:$0x1] %vm362_vm8, %v360_v22  ;;  %v223_v13 = vsel %vm153_vm0, %v201_v23, 0.0 }
  0xb8   : > { %218 = vadd.xlane.f32.xlu1 %v217_v12  ;;  %221 = vadd.xlane.f32.xlu0 %v220_v24 }
  0xbc   : > { %224 = vadd.xlane.f32.xlu1 %v223_v13 }
 0x135   : > { %v204_v25 = vpop.xlane.xlu0 %203 }
 0x136   : > { %v226_v26 = vmul.f32 0.06666667, %v204_v25 }
 0x138   : > { %v234_v29 = vadd.f32 1e-08, %v226_v26 }
 0x139   : > { %v207_v30 = vpop.xlane.xlu1 %206  ;;  %v210_v33 = vpop.xlane.xlu0 %209 }
 0x13a   : > { %570 = vrsqrt.f32 %v234_v29  ;;  %v227_v34 = vmul.f32 0.06666667, %v207_v30  ;;  %v228_v35 = vmul.f32 0.06666667, %v210_v33  ;;  %vm244_vm9 = vcmp.eq.f32.partialorder %v234_v29, inf }
 0x13b   : > { %v247_v61 = vand.u32 2147483648, %v234_v29  ;;  %vm246_vm10 = vcmp.eq.f32.partialorder %v234_v29, 0.0 }
 0x13c   : > { %v235_v36 = vadd.f32 1e-08, %v227_v34  ;;  %v236_v37 = vadd.f32 1e-08, %v228_v35 }
 0x13d   : > { %v213_v38 = vpop.xlane.xlu1 %212  ;;  %v216_v39 = vpop.xlane.xlu0 %215 }
 0x13e   : > { %v229_v41 = vmul.f32 0.06666667, %v213_v38  ;;  %v230_v42 = vmul.f32 0.06666667, %v216_v39  ;;  %572 = vrsqrt.f32 %v235_v36  ;;  %vm251_vm11 = vcmp.eq.f32.partialorder %v235_v36, inf }
 0x13f   : > { %574 = vrsqrt.f32 %v236_v37  ;;  %v254_v1 = vand.u32 2147483648, %v235_v36  ;;  %vm253_vm12 = vcmp.eq.f32.partialorder %v235_v36, 0.0  ;;  %vm258_vm13 = vcmp.eq.f32.partialorder %v236_v37, inf }
 0x140   : > { %v237_v43 = vadd.f32 1e-08, %v229_v41  ;;  %v238_v44 = vadd.f32 1e-08, %v230_v42  ;;  %v261_v4 = vand.u32 2147483648, %v236_v37  ;;  %vm260_vm14 = vcmp.eq.f32.partialorder %v236_v37, 0.0 }
 0x141   : > { %v219_v45 = vpop.xlane.xlu1 %218  ;;  %v222_v46 = vpop.xlane.xlu0 %221 }
 0x142   : > { %v231_v47 = vmul.f32 0.06666667, %v219_v45  ;;  %v232_v48 = vmul.f32 0.06666667, %v222_v46  ;;  %576 = vrsqrt.f32 %v237_v43  ;;  %vm265_vm15 = vcmp.eq.f32.partialorder %v237_v43, inf }
 0x143   : > { %578 = vrsqrt.f32 %v238_v44  ;;  %vm267_vm0 = vcmp.eq.f32.partialorder %v237_v43, 0.0  ;;  %v268_v16 = vand.u32 2147483648, %v237_v43  ;;  %v275_v19 = vand.u32 2147483648, %v238_v44 }
 0x144   : > { %v805_v49 = vadd.f32 1e-08, %v231_v47  ;;  %v807_v50 = vadd.f32 1e-08, %v232_v48 }
 0x145   : > { %v225_v52 = vpop.xlane.xlu1 %224 }
 0x146   : > { %v233_v54 = vmul.f32 0.06666667, %v225_v52  ;;  %580 = vrsqrt.f32 %v805_v49  ;;  %v282_v24 = vand.u32 2147483648, %v805_v49  ;;  %v289_v30 = vand.u32 2147483648, %v807_v50 }
 0x147   : > { %v571_v55 = vpop.eup %570  ;;  %582 = vrsqrt.f32 %v807_v50 }
 0x148   : > { %v243_v56 = vmul.f32 %v571_v55, %v234_v29  ;;  %v811_v57 = vadd.f32 1e-08, %v233_v54 }
 0x14a   : > { %v245_v58 = vsel %vm244_vm9, %v234_v29, %v243_v56  ;;  %584 = vrsqrt.f32 %v811_v57  ;;  %vm272_vm9 = vcmp.eq.f32.partialorder %v238_v44, inf  ;;  %v296_v38 = vand.u32 2147483648, %v811_v57 }
 0x14b   : > { %v573_v59 = vpop.eup %572  ;;  %v248_v0 = vsel %vm246_vm10, %v247_v61, %v245_v58  ;;  %vm274_vm10 = vcmp.eq.f32.partialorder %v238_v44, 0.0 }
 0x14c   : > { %v575_v62 = vpop.eup %574  ;;  %v250_v63 = vmul.f32 %v573_v59, %v235_v36  ;;  %v375_v11 = vrot.slane %v248_v0, %v755_v27 }
 0x14d   : > { %v257_v2 = vmul.f32 %v575_v62, %v236_v37 }
 0x14e   : > { %v252_v3 = vsel %vm251_vm11, %v235_v36, %v250_v63  ;;  %vm279_vm11 = vcmp.eq.f32.partialorder %v805_v49, inf }
 0x14f   : > { %v577_v5 = vpop.eup %576  ;;  %v255_v6 = vsel %vm253_vm12, %v254_v1, %v252_v3  ;;  %v259_v7 = vsel %vm258_vm13, %v236_v37, %v257_v2  ;;  %vm281_vm12 = vcmp.eq.f32.partialorder %v805_v49, 0.0  ;;  %vm288_vm13 = vcmp.eq.f32.partialorder %v807_v50, 0.0 }
 0x150   : > { %v579_v10 = vpop.eup %578  ;;  %v379_v8 = vrot.slane %v255_v6, %v759_v31  ;;  %v262_v9 = vsel %vm260_vm14, %v261_v4, %v259_v7  ;;  %v264_v14 = vmul.f32 %v577_v5, %v237_v43 }
 0x151   : > { %v384_v15 = vrot.slane %v262_v9, %v757_v28  ;;  %v271_v17 = vmul.f32 %v579_v10, %v238_v44 }
 0x152   : > { %v266_v18 = vsel %vm265_vm15, %v237_v43, %v264_v14  ;;  %v380_v20 = vsel %vm317_vm1, %v379_v8, %v375_v11  ;;  %vm286_vm1 = vcmp.eq.f32.partialorder %v807_v50, inf }
 0x153   : > { %v581_v21 = vpop.eup %580  ;;  %v269_v22 = vsel %vm267_vm0, %v268_v16, %v266_v18  ;;  %v273_v12 = vsel %vm272_vm9, %v238_v44, %v271_v17  ;;  %v385_v25 = vsel %vm324_vm2, %v384_v15, %v380_v20  ;;  %vm293_vm2 = vcmp.eq.f32.partialorder %v811_v57, inf }
 0x154   : > { %v583_v27 = vpop.eup %582  ;;  %v278_v31 = vmul.f32 %v581_v21, %v805_v49  ;;  %v276_v28 = vsel %vm274_vm10, %v275_v19, %v273_v12  ;;  %v389_v23 = vrot.slane %v269_v22, %v761_v32 }
 0x155   : > { %v285_v13 = vmul.f32 %v583_v27, %v807_v50  ;;  %v394_v26 = vrot.slane %v276_v28, %v763_v40 }
 0x156   : > { %v280_v29 = vsel %vm279_vm11, %v805_v49, %v278_v31  ;;  %v390_v33 = vsel %vm331_vm3, %v389_v23, %v385_v25  ;;  %vm295_vm3 = vcmp.eq.f32.partialorder %v811_v57, 0.0 }
 0x157   : > { %v585_v34 = vpop.eup %584  ;;  %v283_v32 = vsel %vm281_vm12, %v282_v24, %v280_v29  ;;  %v287_v35 = vsel %vm286_vm1, %v807_v50, %v285_v13  ;;  %v395_v39 = vsel %vm338_vm4, %v394_v26, %v390_v33 }
 0x158   : > { %v292_v36 = vmul.f32 %v585_v34, %v811_v57  ;;  %v290_v37 = vsel %vm288_vm13, %v289_v30, %v287_v35  ;;  %v399_v40 = vrot.slane %v283_v32, %v770_v51 }
 0x159   : > { %v404_v41 = vrot.slane %v290_v37, %v772_v53 }
 0x15a   : > { %v294_v42 = vsel %vm293_vm2, %v811_v57, %v292_v36  ;;  %v400_v43 = vsel %vm345_vm5, %v399_v40, %v395_v39 }
 0x15b   : > { %v297_v51 = vsel %vm295_vm3, %v296_v38, %v294_v42  ;;  %v405_v45 = vsel %vm352_vm6, %v404_v41, %v400_v43 }
 0x15c   : > { %v409_v44 = vrot.slane %v297_v51, %v777_v60 }
 0x15e   : > { %v410_v53 = vsel %vm359_vm7, %v409_v44, %v405_v45 }
 0x15f   : > { %412 = vst.msk [vmem:[%s800_s27 + $0x1] sm:$0x1] %vm362_vm8, %v410_v53 }
 0x160   : > { %599 = shalt.err (!%p596_p5)
}
 0x161   : > { %s600_s15 = scalar_lea.hbm %s848_s3, 32  ;;  %s604_s21 = scalar_lea.hbm %s894_s1, 64 }
 0x162   : > { %p601_p6 = scmp.ne.s32.totalorder %s848_s3, %s600_s15  ;;  %p605_p10 = scmp.lt.s32.totalorder %s848_s3, %s894_s1 }
 0x163   : > { %p606_p11 = scmp.lt.s32.totalorder %s604_s21, %s600_s15 }
 0x164   : > { %p602_p7 = pnand %p601_p6, %p715_p4 }
 0x165   : > { %p607_p12 = por %p606_p11, %p605_p10 }
 0x166   : > { %p603_p9 = pneg %p602_p7 }
 0x168   : > { %p608_p13 = pnand %p607_p12, %p603_p9 }
 0x16a   : > { %611 = shalt.err (!%p608_p13)
}
 0x16b   : > { %515 = dma.vmem_to_hbm [thread:$0]  (%p715_p4), %s429_s29, 32, %s848_s3, %s414_s4  }
 0x16c PF: > { %p521_p0 = scmp.ge.s32.totalorder %s662_s11, 2  ;;  %s440_s24 = sand.u32 1, %s642_s6  }
 0x16d   : > { %s441_s25 = scalar_lea.sflag [#allocation3], %s440_s24 }
 0x16e   : > { %p518_p1 = pnand %p521_p0, %p722_p8 }
 0x170   : > { %p519_p2 = pneg %p518_p1 }
 0x172   : > { %637 = dma.done.wait (%p519_p2), %s441_s25, 32  }
 0x173   : > { %639 = vsyncadd (%p519_p2), %s441_s25, 4294967264  ;;  %s14_s11 = sadd.s32 1, %s662_s11   ;;  %s897_s6 = smov %s646_s7 }
 0x174   : > { %p11_p3 = scmp.ge.s32.totalorder %s14_s11, 4   ;;  %s898_s7 = smov %s650_s8 }
 0x175   : > { %s899_s8 = smov %s728_s19  ;;  %s900_s9 = smov %s658_s10 }
 0x176   : > { %s901_s10 = smov %s903_s14  ;;  %13 = sbr.rel (!%p11_p3) target bundleno = 4 (0x4), region = 59 }
 0x17b   :  { %446 = vsyncpa [#allocation3], 1 }
 0x17c   :  { %448 = vsyncpa [#allocation3 + $0x1], 1 }

</bundles_post_ra>
